<compile_context>
chip_gen: v6e
topology: v6e:2x2x1
jax: 0.10.0
libtpu: 0.0.40
codegen_flags: <defaults>
</compile_context>

<pallas_src>
import functools

import jax
import jax.numpy as jnp
from jax import lax
from jax.experimental import pallas as pl
from jax.experimental.pallas import tpu as pltpu


def _round_up(x, m):
    return ((x + m - 1) // m) * m


def encoder_kernel(x_ref, y_ref,
                   w1_ref, b1_ref,
                   w2_ref, b2_ref,
                   w3_ref, b3_ref,
                   out_ref, *, half):
    # xc = x.clone(); xc[x == -1] = y[x == -1]
    # bf16 VPU select; -1.0 is exactly representable in bf16 so the sentinel
    # compare is exact (assumes inputs use an exact -1 sentinel).
    x = x_ref[...]
    y = y_ref[...]
    xc = jnp.where(x == -1.0, y, x)

    # hidden = relu(fc1(xc))   -- bf16 MXU operands, f32 accumulation
    h = jnp.dot(xc, w1_ref[...], preferred_element_type=jnp.float32) + b1_ref[...]
    h = jnp.maximum(h, 0.0)

    # hidden = relu(fc2(hidden))
    h = jnp.dot(h.astype(jnp.bfloat16), w2_ref[...],
                preferred_element_type=jnp.float32) + b2_ref[...]
    h = jnp.maximum(h, 0.0)

    # fused heads: lanes [0, half) -> z_loc (identity), [half, 2*half) -> exp
    v = jnp.dot(h.astype(jnp.bfloat16), w3_ref[...],
                preferred_element_type=jnp.float32) + b3_ref[...]
    col = lax.broadcasted_iota(jnp.int32, v.shape, dimension=1)
    out_ref[...] = jnp.where(col < half, v, jnp.exp(v))


def prepare_params(params):
    """One-time (init-time) weight preparation: fuse the two heads, pad all
    feature dims to 128 lanes, cast weights to bf16.  Hoisted out of the
    per-call jitted forward path (perf review item #2)."""
    w1, b1, w2, b2, w31, b31, w32, b32 = params
    hidden_1 = w1.shape[1]
    hidden_2 = w2.shape[1]
    z_dim = w31.shape[1]

    h1p = _round_up(hidden_1, 128)
    h2p = _round_up(hidden_2, 128)
    half = max(64, _round_up(z_dim, 64))   # per-head lane width
    outp = 2 * half                        # fused head width (multiple of 128)

    def pad2(a, rows, cols):
        return jnp.pad(a, ((0, rows - a.shape[0]), (0, cols - a.shape[1])))

    w1p = pad2(w1, 784, h1p).astype(jnp.bfloat16)
    b1p = pad2(b1.reshape(1, -1), 1, h1p).astype(jnp.float32)
    w2p = pad2(w2, h1p, h2p).astype(jnp.bfloat16)
    b2p = pad2(b2.reshape(1, -1), 1, h2p).astype(jnp.float32)

    # Fused + padded output head: cols [0, z_dim) = fc31, [half, half+z_dim) = fc32.
    w3p = jnp.zeros((h2p, outp), jnp.float32)
    w3p = w3p.at[:hidden_2, :z_dim].set(w31)
    w3p = w3p.at[:hidden_2, half:half + z_dim].set(w32)
    w3p = w3p.astype(jnp.bfloat16)
    b3p = jnp.zeros((1, outp), jnp.float32)
    b3p = b3p.at[0, :z_dim].set(b31.reshape(-1))
    b3p = b3p.at[0, half:half + z_dim].set(b32.reshape(-1))

    weights = (w1p, b1p, w2p, b2p, w3p, b3p)
    return weights, z_dim


def encoder_forward(x, y, weights, *, z_dim, tb=1024):
    """x, y: (B, 1, 28, 28) or any shape flattening to (B, 784).

    Inputs should ideally already be bf16 (the dominant HBM stream); f32
    inputs are cast once here as a fallback.
    """
    B = x.shape[0]
    x2d = x.reshape(B, 784)
    y2d = y.reshape(B, 784)
    if x2d.dtype != jnp.bfloat16:
        x2d = x2d.astype(jnp.bfloat16)
    if y2d.dtype != jnp.bfloat16:
        y2d = y2d.astype(jnp.bfloat16)

    w1p, b1p, w2p, b2p, w3p, b3p = weights
    h1p = w1p.shape[1]
    h2p = w2p.shape[1]
    outp = w3p.shape[1]
    half = outp // 2

    # ---- batch tiling ------------------------------------------------------
    tb = max(1, min(int(tb), B))
    if B >= 16:
        # v7x megacore: keep >= 2 grid steps so both TensorCores get work.
        tb = min(tb, _round_up(pl.cdiv(B, 2), 8))
    if tb < B:
        tb = min(_round_up(tb, 8), B)   # (8,128) block-shape constraint
    grid = (pl.cdiv(B, tb),)

    batch_map = lambda i: (i, 0)
    const_map = lambda i: (0, 0)
    in_specs = [
        pl.BlockSpec((tb, 784), batch_map),      # x tile (bf16, pipelined)
        pl.BlockSpec((tb, 784), batch_map),      # y tile (bf16, pipelined)
        pl.BlockSpec((784, h1p), const_map),     # weights: VMEM-resident, fetched once
        pl.BlockSpec((1, h1p), const_map),
        pl.BlockSpec((h1p, h2p), const_map),
        pl.BlockSpec((1, h2p), const_map),
        pl.BlockSpec((h2p, outp), const_map),
        pl.BlockSpec((1, outp), const_map),
    ]
    out_spec = pl.BlockSpec((tb, outp), batch_map)

    weight_bytes = 2 * (784 * h1p + h1p * h2p + h2p * outp) + 4 * (h1p + h2p + outp)
    cost = pl.CostEstimate(
        flops=2 * B * (784 * h1p + h1p * h2p + h2p * outp),
        transcendentals=B * outp,
        bytes_accessed=2 * B * 784 * 2 + B * outp * 4 + weight_bytes,
    )

    out = pl.pallas_call(
        functools.partial(encoder_kernel, half=half),
        out_shape=jax.ShapeDtypeStruct((B, outp), jnp.float32),
        grid=grid,
        in_specs=in_specs,
        out_specs=out_spec,
        compiler_params=pltpu.CompilerParams(
            dimension_semantics=("parallel",),          # v7x: shard grid over 2 TCs
            vmem_limit_bytes=32 * 1024 * 1024,          # ~10 MiB working set @ tb=1024 bf16;
                                                        # safe on v5e/v6e (128 MiB) and v7x (64 MiB)
        ),
        cost_estimate=cost,
    )(x2d, y2d, w1p, b1p, w2p, b2p, w3p, b3p)

    z_loc = out[:, :z_dim]
    z_scale = out[:, half:half + z_dim]
    return z_loc, z_scale


def make_params(key, z_dim, hidden_1, hidden_2):
    """Deterministic synthetic parameters (shapes from Encoder.__init__)."""
    keys = jax.random.split(key, 8)

    def linear(kw, kb, fan_in, fan_out):
        bound = 1.0 / jnp.sqrt(fan_in)
        # weight stored (in, out) = transpose of PyTorch's (out, in)
        w = jax.random.uniform(kw, (fan_in, fan_out), jnp.float32, -bound, bound)
        b = jax.random.uniform(kb, (fan_out,), jnp.float32, -bound, bound)
        return w, b

    w1, b1 = linear(keys[0], keys[1], 784, hidden_1)
    w2, b2 = linear(keys[2], keys[3], hidden_1, hidden_2)
    w31, b31 = linear(keys[4], keys[5], hidden_2, z_dim)
    w32, b32 = linear(keys[6], keys[7], hidden_2, z_dim)
    return (w1, b1, w2, b2, w31, b31, w32, b32)


def reference_forward(x, y, params):
    """Plain-JAX (f32) reference matching the PyTorch forward."""
    B = x.shape[0]
    x2d = x.reshape(B, 784).astype(jnp.float32)
    y2d = y.reshape(B, 784).astype(jnp.float32)
    xc = jnp.where(x2d == -1.0, y2d, x2d)
    w1, b1, w2, b2, w31, b31, w32, b32 = params
    h = jnp.maximum(xc @ w1 + b1, 0.0)
    h = jnp.maximum(h @ w2 + b2, 0.0)
    return h @ w31 + b31, jnp.exp(h @ w32 + b32)


if __name__ == "__main__":
    z_dim, hidden_1, hidden_2 = 8, 32, 32
    B = 64                      # small demo batch
    TB = 16                     # small tile so the demo exercises a 4-step grid

    key = jax.random.PRNGKey(0)
    kp, kx, ky, km = jax.random.split(key, 4)

    params = make_params(kp, z_dim, hidden_1, hidden_2)
    # One-time weight prep (fuse heads, pad, bf16) — outside the jitted forward.
    weights, z_dim_prep = prepare_params(params)

    # Inputs: NCHW images (B, 1, 28, 28), produced as bf16 (the kernel's native
    # input dtype).  Some entries set to the exact -1 sentinel so the
    # mask-replacement path (xc[x == -1] = y[x == -1]) is exercised.
    x = jax.random.uniform(kx, (B, 1, 28, 28), jnp.float32).astype(jnp.bfloat16)
    y = jax.random.uniform(ky, (B, 1, 28, 28), jnp.float32).astype(jnp.bfloat16)
    mask = jax.random.bernoulli(km, 0.3, (B, 1, 28, 28))
    x = jnp.where(mask, -1.0, x)

    fwd = jax.jit(functools.partial(encoder_forward, z_dim=z_dim_prep, tb=TB))
    z_loc, z_scale = fwd(x, y, weights)
    jax.block_until_ready((z_loc, z_scale))

    # correctness check against the pure-JAX f32 reference (same bf16 inputs,
    # so the only discrepancy is bf16 MXU operands with f32 accumulation)
    ref_loc, ref_scale = reference_forward(x, y, params)
    assert z_loc.shape == ref_loc.shape and z_scale.shape == ref_scale.shape
    assert jnp.allclose(z_loc, ref_loc, atol=3e-2, rtol=3e-2)
    assert jnp.allclose(z_scale, ref_scale, atol=3e-2, rtol=3e-2)

    print("KERNEL_OK")
</pallas_src>

<mosaic_0001>
module attributes {stable_mosaic.version = 11 : i64} {
  func.func @encoder_kernel(%arg0: i32, %arg1: memref<16x784xbf16, #tpu.memory_space<vmem>>, %arg2: memref<16x784xbf16, #tpu.memory_space<vmem>>, %arg3: memref<784x128xbf16, #tpu.memory_space<vmem>>, %arg4: memref<1x128xf32, #tpu.memory_space<vmem>>, %arg5: memref<128x128xbf16, #tpu.memory_space<vmem>>, %arg6: memref<1x128xf32, #tpu.memory_space<vmem>>, %arg7: memref<128x128xbf16, #tpu.memory_space<vmem>>, %arg8: memref<1x128xf32, #tpu.memory_space<vmem>>, %arg9: memref<16x128xf32, #tpu.memory_space<vmem>>) attributes {dimension_semantics = [#tpu.dimension_semantics<parallel>], iteration_bounds = array<i64: 4>, scalar_prefetch = 0 : i64, scratch_operands = 0 : i64, tpu.core_type = #tpu.core_type<tc>, window_params = [{transform_indices = @transform_0, window_bounds = array<i64: 16, 784>}, {transform_indices = @transform_1, window_bounds = array<i64: 16, 784>}, {pipeline_mode = #tpu.pipeline_mode<synchronous>, transform_indices = @transform_2, window_bounds = array<i64: 784, 128>}, {pipeline_mode = #tpu.pipeline_mode<synchronous>, transform_indices = @transform_3, window_bounds = array<i64: 1, 128>}, {pipeline_mode = #tpu.pipeline_mode<synchronous>, transform_indices = @transform_4, window_bounds = array<i64: 128, 128>}, {pipeline_mode = #tpu.pipeline_mode<synchronous>, transform_indices = @transform_5, window_bounds = array<i64: 1, 128>}, {pipeline_mode = #tpu.pipeline_mode<synchronous>, transform_indices = @transform_6, window_bounds = array<i64: 128, 128>}, {pipeline_mode = #tpu.pipeline_mode<synchronous>, transform_indices = @transform_7, window_bounds = array<i64: 1, 128>}, {transform_indices = @transform_8, window_bounds = array<i64: 16, 128>}]} {
    %c0 = arith.constant 0 : index
    %c0_0 = arith.constant 0 : index
    %0 = vector.load %arg1[%c0, %c0_0] : memref<16x784xbf16, #tpu.memory_space<vmem>>, vector<16x784xbf16>
    %c0_1 = arith.constant 0 : index
    %c0_2 = arith.constant 0 : index
    %1 = vector.load %arg2[%c0_1, %c0_2] : memref<16x784xbf16, #tpu.memory_space<vmem>>, vector<16x784xbf16>
    %cst = arith.constant -1.000000e+00 : bf16
    %2 = vector.broadcast %cst : bf16 to vector<16x784xbf16>
    %3 = arith.cmpf oeq, %0, %2 : vector<16x784xbf16>
    %4 = arith.select %3, %1, %0 : vector<16x784xi1>, vector<16x784xbf16>
    %c0_3 = arith.constant 0 : index
    %c0_4 = arith.constant 0 : index
    %5 = vector.load %arg3[%c0_3, %c0_4] : memref<784x128xbf16, #tpu.memory_space<vmem>>, vector<784x128xbf16>
    %cst_5 = arith.constant dense<0.000000e+00> : vector<16x128xf32>
    %6 = tpu.matmul %4, %5, %cst_5 {dimension_numbers = #tpu.dot_dimension_numbers<[1], [0], [0], [1], [0, 0, 1, 1], [], []>} : vector<16x784xbf16>, vector<784x128xbf16>, vector<16x128xf32> -> vector<16x128xf32>
    %c0_6 = arith.constant 0 : index
    %c0_7 = arith.constant 0 : index
    %7 = vector.load %arg4[%c0_6, %c0_7] : memref<1x128xf32, #tpu.memory_space<vmem>>, vector<1x128xf32>
    %8 = vector.broadcast %7 : vector<1x128xf32> to vector<16x128xf32>
    %9 = arith.addf %6, %8 : vector<16x128xf32>
    %cst_8 = arith.constant 0.000000e+00 : f32
    %10 = vector.broadcast %cst_8 : f32 to vector<16x128xf32>
    %11 = arith.maximumf %9, %10 : vector<16x128xf32>
    %12 = arith.truncf %11 : vector<16x128xf32> to vector<16x128xbf16>
    %c0_9 = arith.constant 0 : index
    %c0_10 = arith.constant 0 : index
    %13 = vector.load %arg5[%c0_9, %c0_10] : memref<128x128xbf16, #tpu.memory_space<vmem>>, vector<128x128xbf16>
    %cst_11 = arith.constant dense<0.000000e+00> : vector<16x128xf32>
    %14 = tpu.matmul %12, %13, %cst_11 {dimension_numbers = #tpu.dot_dimension_numbers<[1], [0], [0], [1], [0, 0, 1, 1], [], []>} : vector<16x128xbf16>, vector<128x128xbf16>, vector<16x128xf32> -> vector<16x128xf32>
    %c0_12 = arith.constant 0 : index
    %c0_13 = arith.constant 0 : index
    %15 = vector.load %arg6[%c0_12, %c0_13] : memref<1x128xf32, #tpu.memory_space<vmem>>, vector<1x128xf32>
    %16 = vector.broadcast %15 : vector<1x128xf32> to vector<16x128xf32>
    %17 = arith.addf %14, %16 : vector<16x128xf32>
    %cst_14 = arith.constant 0.000000e+00 : f32
    %18 = vector.broadcast %cst_14 : f32 to vector<16x128xf32>
    %19 = arith.maximumf %17, %18 : vector<16x128xf32>
    %20 = arith.truncf %19 : vector<16x128xf32> to vector<16x128xbf16>
    %c0_15 = arith.constant 0 : index
    %c0_16 = arith.constant 0 : index
    %21 = vector.load %arg7[%c0_15, %c0_16] : memref<128x128xbf16, #tpu.memory_space<vmem>>, vector<128x128xbf16>
    %cst_17 = arith.constant dense<0.000000e+00> : vector<16x128xf32>
    %22 = tpu.matmul %20, %21, %cst_17 {dimension_numbers = #tpu.dot_dimension_numbers<[1], [0], [0], [1], [0, 0, 1, 1], [], []>} : vector<16x128xbf16>, vector<128x128xbf16>, vector<16x128xf32> -> vector<16x128xf32>
    %c0_18 = arith.constant 0 : index
    %c0_19 = arith.constant 0 : index
    %23 = vector.load %arg8[%c0_18, %c0_19] : memref<1x128xf32, #tpu.memory_space<vmem>>, vector<1x128xf32>
    %24 = vector.broadcast %23 : vector<1x128xf32> to vector<16x128xf32>
    %25 = arith.addf %22, %24 : vector<16x128xf32>
    %26 = tpu.iota {dimensions = array<i32: 1>} : vector<16x128xi32>
    %c64_i32 = arith.constant 64 : i32
    %27 = vector.broadcast %c64_i32 : i32 to vector<16x128xi32>
    %28 = arith.cmpi slt, %26, %27 : vector<16x128xi32>
    %29 = math.exp %25 : vector<16x128xf32>
    %30 = arith.select %28, %25, %29 : vector<16x128xi1>, vector<16x128xf32>
    %c0_20 = arith.constant 0 : index
    %c0_21 = arith.constant 0 : index
    %31 = vector.load %arg9[%c0_20, %c0_21] : memref<16x128xf32, #tpu.memory_space<vmem>>, vector<16x128xf32>
    tpu.vector_store %arg9[%c0_20, %c0_21], %30 {strides = array<i32>} : memref<16x128xf32, #tpu.memory_space<vmem>>, vector<16x128xf32>,
    return
  }
  func.func @transform_0(%arg0: i32) -> (i32, i32) {
    %c0_i32 = arith.constant 0 : i32
    %c0_i32_0 = arith.constant 0 : i32
    return %arg0, %c0_i32 : i32, i32
  }
  func.func @transform_1(%arg0: i32) -> (i32, i32) {
    %c0_i32 = arith.constant 0 : i32
    %c0_i32_0 = arith.constant 0 : i32
    return %arg0, %c0_i32 : i32, i32
  }
  func.func @transform_2(%arg0: i32) -> (i32, i32) {
    %c0_i32 = arith.constant 0 : i32
    %c0_i32_0 = arith.constant 0 : i32
    %c0_i32_1 = arith.constant 0 : i32
    return %c0_i32, %c0_i32_0 : i32, i32
  }
  func.func @transform_3(%arg0: i32) -> (i32, i32) {
    %c0_i32 = arith.constant 0 : i32
    %c0_i32_0 = arith.constant 0 : i32
    %c0_i32_1 = arith.constant 0 : i32
    return %c0_i32, %c0_i32_0 : i32, i32
  }
  func.func @transform_4(%arg0: i32) -> (i32, i32) {
    %c0_i32 = arith.constant 0 : i32
    %c0_i32_0 = arith.constant 0 : i32
    %c0_i32_1 = arith.constant 0 : i32
    return %c0_i32, %c0_i32_0 : i32, i32
  }
  func.func @transform_5(%arg0: i32) -> (i32, i32) {
    %c0_i32 = arith.constant 0 : i32
    %c0_i32_0 = arith.constant 0 : i32
    %c0_i32_1 = arith.constant 0 : i32
    return %c0_i32, %c0_i32_0 : i32, i32
  }
  func.func @transform_6(%arg0: i32) -> (i32, i32) {
    %c0_i32 = arith.constant 0 : i32
    %c0_i32_0 = arith.constant 0 : i32
    %c0_i32_1 = arith.constant 0 : i32
    return %c0_i32, %c0_i32_0 : i32, i32
  }
  func.func @transform_7(%arg0: i32) -> (i32, i32) {
    %c0_i32 = arith.constant 0 : i32
    %c0_i32_0 = arith.constant 0 : i32
    %c0_i32_1 = arith.constant 0 : i32
    return %c0_i32, %c0_i32_0 : i32, i32
  }
  func.func @transform_8(%arg0: i32) -> (i32, i32) {
    %c0_i32 = arith.constant 0 : i32
    %c0_i32_0 = arith.constant 0 : i32
    return %arg0, %c0_i32 : i32, i32
  }
}

</mosaic_0001>

<bundles_post_ra>
// kernel: encoder_forward.1
= control target key start
LH: loop header
LB: loop body
LE: loop exit
PB: predicated region body
PF: predicated region fallthrough
CT: control target
= control target key end

     0   :  { %s1638_s27 = smov 0   ;;  %s1912_s0 = inlined_call_operand.vmem [shape: bf16[64,784], index: 0, kind: input, shape index: {}]   ;;  %s1913_s1 = inlined_call_operand.vmem [shape: bf16[64,784], index: 1, kind: input, shape index: {}]   ;;  %s1914_s2 = inlined_call_operand.vmem [shape: bf16[784,128], index: 2, kind: input, shape index: {}]   ;;  %s1915_s3 = inlined_call_operand.vmem [shape: f32[1,128], index: 3, kind: input, shape index: {}]   ;;  %s1916_s4 = inlined_call_operand.vmem [shape: bf16[128,128], index: 4, kind: input, shape index: {}]   ;;  %s1917_s5 = inlined_call_operand.vmem [shape: f32[1,128], index: 5, kind: input, shape index: {}]   ;;  %s1918_s6 = inlined_call_operand.vmem [shape: bf16[128,128], index: 6, kind: input, shape index: {}]   ;;  %s1919_s7 = inlined_call_operand.vmem [shape: f32[1,128], index: 7, kind: input, shape index: {}]   ;;  %s1920_s8 = inlined_call_operand.vmem [shape: f32[64,128], index: 8, kind: output, shape index: {}]  }
   0x1 LB: > { %s1282_s28 = sadd.s32 4294967295, %s1589_s27   ;;  %p1286_p0 = scmp.ge.s32.totalorder %s1589_s27, 1  ;;  %s1589_s27 = sphi %s1638_s27, %s18_s27  }
   0x2   : > { %p276_p1 = scmp.lt.s32.totalorder %s1589_s27, 5 }
   0x4   : > { %p277_p2 = pnand %p1286_p0, %p276_p1 }
   0x5   : > { %s1287_s15 = sshll.u32 (!%p277_p2), %s1282_s28, 1 }
   0x6   : > { %280 = sbr.rel (%p277_p2) target bundleno = 705 (0x2c1), region = 52  ;;  %p318_p3 = scmp.lt.s32.totalorder (!%p277_p2), %s1287_s15, 7 }
   0xb   : > { %v1514_v0 = vld [vmem:[%s1914_s2 + $0x78] sm:$0xff]   ;;  %v1518_v4 = vld [vmem:[%s1914_s2 + $0x70] sm:$0xff]   ;;  %v1522_v8 = vld [vmem:[%s1914_s2 + $0x68] sm:$0xff]   ;;  %s1922_s15 = smov (!%p318_p3, %s1287_s15), 7  ;;  %v1591_v45 = vmov 0.0   ;;  %vm1592_vm4 = vmmov 0  }
   0xc   : > { %v1515_v1 = vld [vmem:[%s1914_s2 + $0x38] sm:$0xff]   ;;  %1371 = vmatprep.subr.bf16.mxu0 %v1514_v0  ;;  %v1519_v5 = vld [vmem:[%s1914_s2 + $0x30] sm:$0xff]   ;;  %v1523_v9 = vld [vmem:[%s1914_s2 + $0x28] sm:$0xff]   ;;  %s1503_s18 = smul.u32 28, %s1922_s15  ;;  %vm805_vm5 = vcmask 130048  }
   0xd   : > { %v1516_v2 = vld [vmem:[%s1914_s2 + $0xf8] sm:$0xff]   ;;  %1372 = vmatpush3.bf16.msra.mxu0 %v1515_v1  ;;  %v1520_v6 = vld [vmem:[%s1914_s2 + $0xf0] sm:$0xff]   ;;  %v1524_v10 = vld [vmem:[%s1914_s2 + $0xe8] sm:$0xff]  }
   0xe   : > { %v1517_v3 = vld [vmem:[%s1914_s2 + $0xb8] sm:$0xff]   ;;  %1393 = vmatprep.subr.bf16.mxu1 %v1516_v2  ;;  %1373 = vmatprep.subr.bf16.mxu0 %v1518_v4  ;;  %v1521_v7 = vld [vmem:[%s1914_s2 + $0xb0] sm:$0xff]   ;;  %v1525_v11 = vld [vmem:[%s1914_s2 + $0xa8] sm:$0xff]   ;;  %s1741_s30 = scalar_lea.vmem %s1912_s0, %s1503_s18  ;;  %s1746_s11 = scalar_lea.vmem %s1913_s1, %s1503_s18 }
   0xf   : > { %1394 = vmatpush3.bf16.msra.mxu1 %v1517_v3  ;;  %v1526_v12 = vld [vmem:[%s1914_s2 + $0x60] sm:$0xff]   ;;  %v1530_v16 = vld [vmem:[%s1914_s2 + $0x58] sm:$0xff]   ;;  %v1534_v20 = vld [vmem:[%s1914_s2 + $0x50] sm:$0xff]  }
  0x10   : > { %1395 = vmatprep.subr.bf16.mxu1 %v1520_v6  ;;  %v1527_v13 = vld [vmem:[%s1914_s2 + $0x20] sm:$0xff]   ;;  %v1531_v17 = vld [vmem:[%s1914_s2 + $0x18] sm:$0xff]   ;;  %v1535_v21 = vld [vmem:[%s1914_s2 + $0x10] sm:$0xff]  }
  0x11   : > { %1374 = vmatpush3.bf16.msra.mxu0 %v1519_v5  ;;  %v1528_v14 = vld [vmem:[%s1914_s2 + $0xe0] sm:$0xff]   ;;  %v1532_v18 = vld [vmem:[%s1914_s2 + $0xd8] sm:$0xff]   ;;  %v1536_v22 = vld [vmem:[%s1914_s2 + $0xd0] sm:$0xff]  }
  0x12   : > { %1375 = vmatprep.subr.bf16.mxu0 %v1522_v8  ;;  %v1529_v15 = vld [vmem:[%s1914_s2 + $0xa0] sm:$0xff]   ;;  %v1533_v19 = vld [vmem:[%s1914_s2 + $0x98] sm:$0xff]   ;;  %v1537_v23 = vld [vmem:[%s1914_s2 + $0x90] sm:$0xff]  }
  0x13   : > { %1396 = vmatpush3.bf16.msra.mxu1 %v1521_v7  ;;  %v1538_v24 = vld [vmem:[%s1914_s2 + $0x48] sm:$0xff]   ;;  %v1542_v28 = vld [vmem:[%s1914_s2 + $0x40] sm:$0xff]   ;;  %v1546_v40 = vld [vmem:[%s1914_s2 + $0x178] sm:$0xff]  }
  0x14   : > { %1397 = vmatprep.subr.bf16.mxu1 %v1524_v10  ;;  %v1539_v25 = vld [vmem:[%s1914_s2 + $0x8] sm:$0xff]   ;;  %v1543_v29 = vld [vmem:[%s1914_s2] sm:$0xff]   ;;  %v1547_v48 = vld [vmem:[%s1914_s2 + $0x138] sm:$0xff]  }
  0x15   : > { %1376 = vmatpush3.bf16.msra.mxu0 %v1523_v9  ;;  %v1540_v26 = vld [vmem:[%s1914_s2 + $0xc8] sm:$0xff]   ;;  %v1544_v30 = vld [vmem:[%s1914_s2 + $0xc0] sm:$0xff]   ;;  %v1548_v51 = vld [vmem:[%s1914_s2 + $0x170] sm:$0xff]  }
  0x16   : > { %1377 = vmatprep.subr.bf16.mxu0 %v1526_v12  ;;  %v1541_v27 = vld [vmem:[%s1914_s2 + $0x88] sm:$0xff]   ;;  %v339_v31 = vld [vmem:[%s1741_s30] sm:$0xff]  ;;  %v1549_v52 = vld [vmem:[%s1914_s2 + $0x130] sm:$0xff]  }
  0x17   : > { %1398 = vmatpush3.bf16.msra.mxu1 %v1525_v11  ;;  %v343_v32 = vld [vmem:[%s1741_s30 + $0x1c] sm:$0xff]  ;;  %vm355_vm0 = vcmp.eq.bf16.partialorder %v339_v31, 3212885888  ;;  %v340_v41 = vld [vmem:[%s1741_s30 + $0x8] sm:$0xff]  ;;  %v1556_v59 = vld [vmem:[%s1914_s2 + $0x150] sm:$0xff]  }
  0x18   : > { %1399 = vmatprep.subr.bf16.mxu1 %v1528_v14  ;;  %v347_v33 = vld [vmem:[%s1746_s11] sm:$0xff]  ;;  %vm359_vm1 = vcmp.eq.bf16.partialorder %v343_v32, 3212885888  ;;  %v348_v43 = vld [vmem:[%s1746_s11 + $0x8] sm:$0xff]  ;;  %vm356_vm2 = vcmp.eq.bf16.partialorder %v340_v41, 3212885888 }
  0x19   : > { %1378 = vmatpush3.bf16.msra.mxu0 %v1527_v13  ;;  %v351_v34 = vld [vmem:[%s1746_s11 + $0x1c] sm:$0xff]  ;;  %v363_v36 = vsel %vm355_vm0, %v347_v33, %v339_v31  ;;  %v344_v42 = vld [vmem:[%s1741_s30 + $0x24] sm:$0xff]  ;;  %v364_v46 = vsel %vm356_vm2, %v348_v43, %v340_v41  ;;  %v341_v61 = vld [vmem:[%s1741_s30 + $0x10] sm:$0xff] }
  0x1a   : > { %1379 = vmatprep.subr.bf16.mxu0 %v1530_v16  ;;  %v1545_v35 = vld [vmem:[%s1914_s2 + $0x80] sm:$0xff]   ;;  %v367_v37 = vsel %vm359_vm1, %v351_v34, %v343_v32  ;;  %vm360_vm3 = vcmp.eq.bf16.partialorder %v344_v42, 3212885888  ;;  %v1550_v53 = vld [vmem:[%s1914_s2 + $0x168] sm:$0xff]   ;;  %v1554_v57 = vld [vmem:[%s1914_s2 + $0x158] sm:$0xff]  }
  0x1b   : > { %1400 = vmatpush3.bf16.msra.mxu1 %v1529_v15  ;;  %v1294_v38 = vcombine.low %v363_v36, %v367_v37  ;;  %v1295_v39 = vcombine.high %v363_v36, %v367_v37  ;;  %v352_v44 = vld [vmem:[%s1746_s11 + $0x24] sm:$0xff]  ;;  %v1555_v58 = vld [vmem:[%s1914_s2 + $0x118] sm:$0xff]   ;;  %v345_v62 = vld [vmem:[%s1741_s30 + $0x2c] sm:$0xff]  ;;  %vm357_vm6 = vcmp.eq.bf16.partialorder %v341_v61, 3212885888 }
  0x1c   : > { %1401 = vmatprep.subr.bf16.mxu1 %v1532_v18  ;;  %v368_v47 = vsel %vm360_vm3, %v352_v44, %v344_v42  ;;  %v1551_v54 = vld [vmem:[%s1914_s2 + $0x128] sm:$0xff]   ;;  %v1552_v55 = vld [vmem:[%s1914_s2 + $0x160] sm:$0xff]   ;;  %v1557_v63 = vld [vmem:[%s1914_s2 + $0x110] sm:$0xff]   ;;  %vm361_vm7 = vcmp.eq.bf16.partialorder %v345_v62, 3212885888 }
  0x1d   : > { %1380 = vmatpush3.bf16.msra.mxu0 %v1531_v17  ;;  %841 = vmatprep.mubr.bf16.mxu0 %v1295_v39  ;;  %v1296_v49 = vcombine.low %v364_v46, %v368_v47  ;;  %v1297_v50 = vcombine.high %v364_v46, %v368_v47  ;;  %v1553_v56 = vld [vmem:[%s1914_s2 + $0x120] sm:$0xff]   ;;  %v349_v0 = vld [vmem:[%s1746_s11 + $0x10] sm:$0xff]  ;;  %v1558_v2 = vld [vmem:[%s1914_s2 + $0x148] sm:$0xff]  }
  0x1e   : > { %1381 = vmatprep.subr.bf16.mxu0 %v1534_v20  ;;  %v1562_v60 = vld [vmem:[%s1914_s2 + $0x180] sm:$0xff]   ;;  %v353_v1 = vld [vmem:[%s1746_s11 + $0x2c] sm:$0xff]  ;;  %v365_v3 = vsel %vm357_vm6, %v349_v0, %v341_v61  ;;  %v342_v5 = vld [vmem:[%s1741_s30 + $0x18] sm:$0xf] }
  0x1f   : > { %1402 = vmatpush3.bf16.msra.mxu1 %v1533_v19  ;;  %882 = vmatprep.mubr.bf16.mxu1 %v1297_v50  ;;  %v369_v4 = vsel %vm361_vm7, %v353_v1, %v345_v62  ;;  %v346_v6 = vld [vmem:[%s1741_s30 + $0x34] sm:$0xf]  ;;  %v350_v7 = vld [vmem:[%s1746_s11 + $0x18] sm:$0xf]  ;;  %vm358_vm8 = vcmp.eq.bf16.partialorder %v342_v5, 3212885888 }
  0x20   : > { %1403 = vmatprep.subr.bf16.mxu1 %v1536_v22  ;;  %v1299_v8 = vcombine.high %v365_v3, %v369_v4  ;;  %v354_v9 = vld [vmem:[%s1746_s11 + $0x34] sm:$0xf]  ;;  %vm362_vm9 = vcmp.eq.bf16.partialorder %v346_v6, 3212885888  ;;  %v366_v10 = vsel %vm358_vm8, %v350_v7, %v342_v5  ;;  %v1559_v12 = vld [vmem:[%s1914_s2 + $0x108] sm:$0xff]   ;;  %v1560_v14 = vld [vmem:[%s1914_s2 + $0x140] sm:$0xff]   ;;  %v1298_v16 = vcombine.low %v365_v3, %v369_v4 }
  0x21   : > { %1382 = vmatpush3.bf16.msra.mxu0 %v1535_v21  ;;  %v370_v11 = vsel %vm362_vm9, %v354_v9, %v346_v6  ;;  %v1561_v15 = vld [vmem:[%s1914_s2 + $0x100] sm:$0xff]   ;;  %v1563_v17 = vld [vmem:[%s1916_s4 + $0x38] sm:$0xff]   ;;  %v1564_v18 = vld [vmem:[%s1916_s4 + $0x30] sm:$0xff]   ;;  %s1292_s30 = sshll.u32 %s1922_s15, 3 }
  0x22   : > { %1383 = vmatprep.subr.bf16.mxu0 %v1538_v24  ;;  %v1300_v13 = vcombine.low %v366_v10, %v370_v11  ;;  %v1565_v19 = vld [vmem:[%s1916_s4 + $0x28] sm:$0xff]   ;;  %v1566_v20 = vld [vmem:[%s1916_s4 + $0x20] sm:$0xff]   ;;  %v1567_v21 = vld [vmem:[%s1916_s4 + $0x18] sm:$0xff]   ;;  %s335_s16 = scalar_lea.vmem %s1920_s8, %s1292_s30 }
  0x23   : > { %1404 = vmatpush3.bf16.msra.mxu1 %v1537_v23  ;;  %v1568_v22 = vld [vmem:[%s1916_s4 + $0x10] sm:$0xff]   ;;  %v1569_v23 = vld [vmem:[%s1916_s4 + $0x8] sm:$0xff]   ;;  %v1570_v24 = vld [vmem:[%s1916_s4] sm:$0xff]  }
  0x24   : > { %1405 = vmatprep.subr.bf16.mxu1 %v1540_v26  ;;  %v1572_v26 = vld [vmem:[%s1918_s6 + $0x30] sm:$0xff]   ;;  %v1293_v42 = vld [vmem:[%s1915_s3] ss:$0 sm:$0xff] }
  0x25   : > { %1384 = vmatpush3.bf16.msra.mxu0 %v1539_v25  ;;  %v1571_v25 = vld [vmem:[%s1918_s6 + $0x38] sm:$0xff]   ;;  %v1576_v1 = vld [vmem:[%s1918_s6 + $0x10] sm:$0xff]   ;;  %v1578_v3 = vld [vmem:[%s1918_s6] sm:$0xff]  }
  0x26   : > { %1385 = vmatprep.subr.bf16.mxu0 %v1542_v28  ;;  %v1574_v28 = vld [vmem:[%s1918_s6 + $0x20] sm:$0xff]  }
  0x27   : > { %1406 = vmatpush3.bf16.msra.mxu1 %v1541_v27  ;;  %v1573_v27 = vld [vmem:[%s1918_s6 + $0x28] sm:$0xff]   ;;  %v1351_v4 = vld [vmem:[%s1917_s5] ss:$0 sm:$0xff] }
  0x28   : > { %1407 = vmatprep.subr.bf16.mxu1 %v1544_v30 }
  0x29   : > { %1386 = vmatpush3.bf16.msra.mxu0 %v1543_v29  ;;  %v1575_v29 = vld [vmem:[%s1918_s6 + $0x18] sm:$0xff]  }
  0x2a   : > { %1415 = vmatprep.subr.bf16.mxu0 %v1546_v40 }
  0x2b   : > { %1408 = vmatpush3.bf16.msra.mxu1 %v1545_v35 }
  0x2c   : > { %1457 = vmatprep.subr.bf16.mxu1 %v1591_v45  ;;  %842 = vmatmul.mubr.bf16.vlgmr.msra.gmra.mxu0 %v1294_v38 }
  0x2d   : > { %1416 = vmatpush3.bf16.msra.mxu0 %v1547_v48  ;;  %923 = vmatprep.mubr.bf16.mxu0 %v1299_v8 }
  0x2e   : > { %1417 = vmatprep.subr.bf16.mxu0 %v1548_v51  ;;  %883 = vmatmul.mubr.bf16.vlgmr.msra.gmra.mxu1 %v1296_v49 }
  0x2f   : > { %1459 = vmatprep.mubr.msk.bf16.mxu1 %vm1592_vm4, %v1591_v45  ;;  %1458 = vmatpush3.bf16.msra.mxu1 %v1562_v60 }
  0x30   : > { %1463 = vmatprep.subr.bf16.mxu1 %v1591_v45 }
  0x31   : > { %1418 = vmatpush3.bf16.msra.mxu0 %v1549_v52 }
  0x32   : > { %1419 = vmatprep.subr.bf16.mxu0 %v1550_v53 }
  0x35   : > { %1420 = vmatpush3.bf16.msra.mxu0 %v1551_v54 }
  0x36   : > { %1421 = vmatprep.subr.bf16.mxu0 %v1552_v55  ;;  %1460 = vmatmul.mubr.msk.bf16.vlgmr.msra.gmra.mxu1 %vm805_vm5, %v1300_v13 }
  0x37   : > { %1479 = vmatprep.mubr.msk.bf16.mxu1 %vm1592_vm4, %v1591_v45  ;;  %1464 = vmatpush3.bf16.msra.mxu1 %v1563_v17 }
  0x38   : > { %1465 = vmatprep.subr.bf16.mxu1 %v1591_v45 }
  0x39   : > { %1422 = vmatpush3.bf16.msra.mxu0 %v1553_v56 }
  0x3a   : > { %1423 = vmatprep.subr.bf16.mxu0 %v1554_v57 }
  0x3b   : > { %1466 = vmatpush3.bf16.msra.mxu1 %v1564_v18 }
  0x3c   : > { %1467 = vmatprep.subr.bf16.mxu1 %v1591_v45 }
  0x3d   : > { %1424 = vmatpush3.bf16.msra.mxu0 %v1555_v58 }
  0x3e   : > { %1425 = vmatprep.subr.bf16.mxu0 %v1556_v59 }
  0x3f   : > { %1468 = vmatpush3.bf16.msra.mxu1 %v1565_v19 }
  0x40   : > { %1469 = vmatprep.subr.bf16.mxu1 %v1591_v45 }
  0x41   : > { %1426 = vmatpush3.bf16.msra.mxu0 %v1557_v63 }
  0x42   : > { %1427 = vmatprep.subr.bf16.mxu0 %v1558_v2  ;;  %v1577_v2 = vld [vmem:[%s1918_s6 + $0x8] sm:$0xff]  }
  0x43   : > { %1470 = vmatpush3.bf16.msra.mxu1 %v1566_v20 }
  0x44   : > { %1471 = vmatprep.subr.bf16.mxu1 %v1591_v45 }
  0x45   : > { %1428 = vmatpush3.bf16.msra.mxu0 %v1559_v12 }
  0x46   : > { %1429 = vmatprep.subr.bf16.mxu0 %v1560_v14 }
  0x47   : > { %1472 = vmatpush3.bf16.msra.mxu1 %v1567_v21 }
  0x48   : > { %1473 = vmatprep.subr.bf16.mxu1 %v1591_v45 }
  0x49   : > { %1430 = vmatpush3.bf16.msra.mxu0 %v1561_v15 }
  0x4a   : > { %1483 = vmatprep.subr.bf16.mxu0 %v1591_v45 }
  0x4b   : > { %1474 = vmatpush3.bf16.msra.mxu1 %v1568_v22  ;;  %v1203_v22 = vlaneseq }
  0x4c   : > { %924 = vmatmul.mubr.bf16.vlgmr.msra.gmra.mxu0 %v1298_v16  ;;  %1475 = vmatprep.subr.bf16.mxu1 %v1591_v45 }
  0x4d   : > { %1499 = vmatprep.mubr.msk.bf16.mxu0 %vm1592_vm4, %v1591_v45  ;;  %1484 = vmatpush3.bf16.msra.mxu0 %v1571_v25 }
  0x4e   : > { %1485 = vmatprep.subr.bf16.mxu0 %v1591_v45 }
  0x4f   : > { %1476 = vmatpush3.bf16.msra.mxu1 %v1569_v23  ;;  %v1204_v23 = vand.u32 127, %v1203_v22 }
  0x50   : > { %1477 = vmatprep.subr.bf16.mxu1 %v1591_v45 }
  0x51   : > { %1486 = vmatpush3.bf16.msra.mxu0 %v1572_v26  ;;  %vm1205_vm10 = vcmp.lt.s32.totalorder %v1204_v23, 64 }
  0x52   : > { %1487 = vmatprep.subr.bf16.mxu0 %v1591_v45 }
  0x53   : > { %1478 = vmatpush3.bf16.msra.mxu1 %v1570_v24 }
  0x55   : > { %1488 = vmatpush3.bf16.msra.mxu0 %v1573_v27 }
  0x56   : > { %1489 = vmatprep.subr.bf16.mxu0 %v1591_v45 }
  0x59   : > { %1490 = vmatpush3.bf16.msra.mxu0 %v1574_v28 }
  0x5a   : > { %1491 = vmatprep.subr.bf16.mxu0 %v1591_v45 }
  0x5d   : > { %1492 = vmatpush3.bf16.msra.mxu0 %v1575_v29 }
  0x5e   : > { %1493 = vmatprep.subr.bf16.mxu0 %v1591_v45 }
  0x61   : > { %1494 = vmatpush3.bf16.msra.mxu0 %v1576_v1 }
  0x62   : > { %1495 = vmatprep.subr.bf16.mxu0 %v1591_v45 }
  0x65   : > { %1496 = vmatpush3.bf16.msra.mxu0 %v1577_v2 }
  0x66   : > { %1497 = vmatprep.subr.bf16.mxu0 %v1591_v45  ;;  %v1360_v45 = vld [vmem:[%s1919_s7] ss:$0 sm:$0xff] }
  0x69   : > { %1498 = vmatpush3.bf16.msra.mxu0 %v1578_v3 }
  0xec   : > { %v1387_v33 = vpop.f32.mrf.mxu0 }
  0xee   : > { %v1409_v30 = vpop.f32.mrf.mxu1  ;;  %v1388_v35 = vpop.f32.mrf.mxu0 }
  0xef   : > { %v1389_v40 = vadd.f32 %v1388_v35, %v1387_v33 }
  0xf0   : > { %v1410_v31 = vpop.f32.mrf.mxu1  ;;  %v1390_v38 = vpop.f32.mrf.mxu0 }
  0xf1   : > { %v844_v44 = vadd.f32 %v1389_v40, %v1293_v42  ;;  %v1411_v46 = vadd.f32 %v1410_v31, %v1409_v30 }
  0xf2   : > { %v1412_v32 = vpop.f32.mrf.mxu1  ;;  %v1391_v43 = vpop.f32.mrf.mxu0 }
  0xf3   : > { %v1392_v47 = vadd.f32 %v1391_v43, %v1390_v38  ;;  %v885_v50 = vadd.f32 %v1411_v46, %v844_v44 }
  0xf4   : > { %v1413_v34 = vpop.f32.mrf.mxu1 }
  0xf5   : > { %v847_v51 = vadd.f32 %v1392_v47, %v1293_v42  ;;  %v1414_v52 = vadd.f32 %v1413_v34, %v1412_v32 }
  0xf6   : > { %v966_v36 = vpop.f32.mrf.mxu1 }
  0xf7   : > { %v888_v57 = vadd.f32 %v1414_v52, %v847_v51 }
  0xf8   : > { %v1461_v37 = vpop.f32.mrf.mxu1 }
  0xfa   : > { %v969_v39 = vpop.f32.mrf.mxu1 }
  0xfc   : > { %v1462_v41 = vpop.f32.mrf.mxu1 }
 0x10c   : > { %v1431_v48 = vpop.f32.mrf.mxu0 }
 0x10e   : > { %v1432_v49 = vpop.f32.mrf.mxu0 }
 0x10f   : > { %v1433_v53 = vadd.f32 %v1432_v49, %v1431_v48 }
 0x110   : > { %v1434_v54 = vpop.f32.mrf.mxu0 }
 0x111   : > { %v926_v55 = vadd.f32 %v1433_v53, %v885_v50 }
 0x112   : > { %v1435_v56 = vpop.f32.mrf.mxu0 }
 0x113   : > { %v1436_v58 = vadd.f32 %v1435_v56, %v1434_v54  ;;  %v967_v59 = vadd.f32 %v966_v36, %v926_v55 }
 0x115   : > { %v929_v60 = vadd.f32 %v1436_v58, %v888_v57  ;;  %v973_v62 = vmax.f32 %v967_v59, 0.0 }
 0x117   : > { %v970_v61 = vadd.f32 %v969_v39, %v929_v60 }
 0x119   : > { %v974_v63 = vmax.f32 %v970_v61, 0.0 }
 0x11b   : > { %v975_v0 = vpack.c.bf16 %v974_v63, %v973_v62 }
 0x11d   : > { %1480 = vmatmul.mubr.bf16.vlgmr.msra.gmra.mxu1 %v975_v0 }
 0x1dd   : > { %v1081_v5 = vpop.f32.mrf.mxu1 }
 0x1de   : > { %v1082_v7 = vadd.f32 %v1351_v4, %v1081_v5 }
 0x1df   : > { %v1481_v6 = vpop.f32.mrf.mxu1 }
 0x1e0   : > { %v1088_v11 = vmax.f32 %v1082_v7, 0.0 }
 0x1e1   : > { %v1084_v8 = vpop.f32.mrf.mxu1 }
 0x1e2   : > { %v1085_v9 = vadd.f32 %v1351_v4, %v1084_v8 }
 0x1e3   : > { %v1482_v10 = vpop.f32.mrf.mxu1 }
 0x1e4   : > { %v1089_v12 = vmax.f32 %v1085_v9, 0.0 }
 0x1e6   : > { %v1090_v13 = vpack.c.bf16 %v1089_v12, %v1088_v11 }
 0x1e8   : > { %1500 = vmatmul.mubr.bf16.vlgmr.msra.gmra.mxu0 %v1090_v13 }
 0x2a8   : > { %v1196_v14 = vpop.f32.mrf.mxu0 }
 0x2a9   : > { %v1197_v15 = vadd.f32 %v1360_v45, %v1196_v14 }
 0x2aa   : > { %v1501_v16 = vpop.f32.mrf.mxu0 }
 0x2ab   : > { %v1206_v17 = vmul.f32 1.442695, %v1197_v15 }
 0x2ac   : > { %v1199_v18 = vpop.f32.mrf.mxu0 }
 0x2ad   : > { %1579 = vpow2.f32 %v1206_v17  ;;  %v1200_v19 = vadd.f32 %v1360_v45, %v1199_v18 }
 0x2ae   : > { %v1502_v20 = vpop.f32.mrf.mxu0 }
 0x2af   : > { %v1208_v21 = vmul.f32 1.442695, %v1200_v19 }
 0x2b1   : > { %1581 = vpow2.f32 %v1208_v21 }
 0x2ba   : > { %v1580_v24 = vpop.eup %1579 }
 0x2bb   : > { %v1210_v25 = vsel %vm1205_vm10, %v1197_v15, %v1580_v24 }
 0x2bc   : > { %1212 = vst [vmem:[%s335_s16] sm:$0xff] %v1210_v25 }
 0x2be   : > { %v1582_v26 = vpop.eup %1581 }
 0x2bf   : > { %v1211_v27 = vsel %vm1205_vm10, %v1200_v19, %v1582_v26 }
 0x2c0   : > { %1213 = vst [vmem:[%s335_s16 + $0x8] sm:$0xff] %v1211_v27 }
 0x2c1 PF: > { %s18_s27 = sadd.s32 1, %s1589_s27  }
 0x2c2   : > { %p15_p4 = scmp.ge.s32.totalorder %s18_s27, 6  }
 0x2c4   :  { %17 = sbr.rel (!%p15_p4) target bundleno = 1 (0x1), region = 85 }

</bundles_post_ra>
